<compile_context>
chip_gen: v7x
topology: tpu7x:2x2x1
jax: 0.10.0
libtpu: 0.0.40
codegen_flags: <defaults>
</compile_context>

<pallas_src>
import jax
import jax.numpy as jnp
from jax import lax
from jax.experimental import pallas as pl
from jax.experimental.pallas import tpu as pltpu


def _birnn_recurrence_kernel(xin_ref, m_ref, whh_ref, out_ref, hid_ref):
    """Fused bidirectional masked tanh-RNN recurrence.

    xin_ref : (S, TB, 2H) f32  projected inputs; lanes [0:H) forward direction in time
                               order, lanes [H:2H) backward direction, time-REVERSED.
    m_ref   : (S, TB, 2H) f32  binary mask, same layout (backward half time-reversed).
    whh_ref : (2H, 2H)   bf16  block-diagonal recurrent weights [Whh_f, 0; 0, Whh_b].
    out_ref : (S, TB, 2H) f32  masked per-step outputs (backward half in reversed time).
    hid_ref : (TB, 2H)    f32  final hidden state [h_fwd | h_bwd].
    """
    S = xin_ref.shape[0]
    whh = whh_ref[...]                        # hoisted once; bf16 MXU operand

    def step(t, h):                           # h: (TB, 2H) f32 carried state
        xin = xin_ref[t]                      # leading-axis slice: cheap view
        m = m_ref[t]
        cand = jnp.tanh(xin + jnp.dot(h.astype(jnp.bfloat16), whh,
                                      preferred_element_type=jnp.float32))
        out_ref[t] = m * cand                 # == m * h_new (mask binary); ONE full-width store
        return h + m * (cand - h)             # == m*cand + (1-m)*h

    h0 = jnp.zeros(hid_ref.shape, jnp.float32)
    # Static trip count; fully unrolled for small S (LLO scheduler visibility),
    # partially unrolled for long sequences to bound code size.
    unroll = True if S <= 32 else 4
    h_final = lax.fori_loop(0, S, step, h0, unroll=unroll)
    hid_ref[...] = h_final


def flexible_rnn_layer(embedded, mask, params, config, hidden=None, return_hidden=True,
                       **kwrgs):
    """JAX/Pallas equivalent of FlexibleRNNLayer.forward (batch-first embedded)."""
    B, S, D = embedded.shape
    H = params["whh_f"].shape[0]
    H2 = 2 * H
    f32 = jnp.float32

    embedded = embedded.astype(f32)
    mask_f = mask.astype(f32)

    # ---- one-shot input projection for BOTH directions (plain XLA matmul) ----
    wih_cat = jnp.concatenate([params["wih_f"], params["wih_b"]], axis=1)      # (D, 2H)
    bih_cat = jnp.concatenate([params["b_f"], params["b_b"]], axis=1)          # (1, 2H)
    xp = jnp.einsum("bsd,dh->bsh", embedded, wih_cat) + bih_cat                # (B, S, 2H)

    # ---- pre-align both directions to ONE loop order (backward half time-reversed) ----
    xin = jnp.concatenate([xp[:, :, :H], xp[:, ::-1, H:]], axis=-1)            # (B, S, 2H)
    m_full = jnp.concatenate(
        [jnp.broadcast_to(mask_f[:, :, None], (B, S, H)),
         jnp.broadcast_to(mask_f[:, ::-1, None], (B, S, H))], axis=-1)         # (B, S, 2H)

    # time-major so every per-step access in-kernel is a leading-axis slice
    xin_tm = jnp.transpose(xin, (1, 0, 2))                                     # (S, B, 2H)
    m_tm = jnp.transpose(m_full, (1, 0, 2))                                    # (S, B, 2H)

    # block-diagonal recurrent weights: both directions advance in ONE MXU push per step
    whh_cat = jnp.zeros((H2, H2), f32)
    whh_cat = whh_cat.at[:H, :H].set(params["whh_f"])
    whh_cat = whh_cat.at[H:, H:].set(params["whh_b"])
    whh_bf16 = whh_cat.astype(jnp.bfloat16)                                    # bf16 MXU operand

    # ---- batch tiling: split only when it buys a second TensorCore (v7x) ----
    TB = B // 2 if (B >= 16 and B % 16 == 0) else B    # TB multiple of 8 whenever nb > 1
    nb = B // TB

    cost = pl.CostEstimate(
        flops=2 * S * B * H2 * H2,
        transcendentals=S * B * H2,
        bytes_accessed=4 * (3 * S * B * H2 + B * H2) + 2 * H2 * H2)

    grid_spec = pltpu.PrefetchScalarGridSpec(
        num_scalar_prefetch=0,
        grid=(nb,),
        in_specs=[
            pl.BlockSpec((S, TB, H2), lambda b: (0, b, 0)),    # projected inputs (loop order)
            pl.BlockSpec((S, TB, H2), lambda b: (0, b, 0)),    # full-width binary mask
            pl.BlockSpec((H2, H2),    lambda b: (0, 0)),       # block-diag W_hh (bf16)
        ],
        out_specs=(
            pl.BlockSpec((S, TB, H2), lambda b: (0, b, 0)),    # masked rnn outputs (loop order)
            pl.BlockSpec((TB, H2),    lambda b: (b, 0)),       # final hidden [fwd | bwd]
        ),
    )

    rnn_loop, hid_cat = pl.pallas_call(
        _birnn_recurrence_kernel,
        out_shape=(jax.ShapeDtypeStruct((S, B, H2), f32),
                   jax.ShapeDtypeStruct((B, H2), f32)),
        grid_spec=grid_spec,
        compiler_params=pltpu.CompilerParams(
            dimension_semantics=("parallel",),
            vmem_limit_bytes=32 * 1024 * 1024),
        cost_estimate=cost,
    )(xin_tm, m_tm, whh_bf16)

    # un-reverse the backward half once (back to original time order); batch-first
    rnn_out = jnp.concatenate([rnn_loop[:, :, :H], rnn_loop[::-1, :, H:]], axis=-1)
    rnn_out = jnp.transpose(rnn_out, (1, 0, 2))                                # (B, S, 2H)
    hid = jnp.stack([hid_cat[:, :H], hid_cat[:, H:]], axis=0)                  # (2, B, H)

    if config["other_stuff"].get("output_representations", False):
        return rnn_out                    # raw rnn outputs, pre-linear (as in torch)

    # additional_linear_layer over all positions (padded rows -> bias, as torch does)
    outputs = jnp.einsum("bso,op->bsp", rnn_out, params["w_lin"]) + params["b_lin"]

    if config["rnn_layer"]["bidirectional"]:
        forward_output = outputs[:, :, : outputs.shape[-1] // 2]
        backward_output = outputs[:, :, outputs.shape[-1] // 2:]
    else:
        forward_output = outputs
        backward_output = None

    kwrgs["forward_output"] = forward_output
    kwrgs["backward_output"] = backward_output
    kwrgs["hidden"] = hid if return_hidden else None
    return kwrgs


def _reference(embedded, mask, params):
    """Pure-JAX reference for correctness check (unfused, full-S loop)."""
    B, S, D = embedded.shape
    H = params["whh_f"].shape[0]
    xproj_f = jnp.einsum("bsd,dh->bsh", embedded, params["wih_f"]) + params["b_f"]
    xproj_b = jnp.einsum("bsd,dh->bsh", embedded, params["wih_b"]) + params["b_b"]
    h_f = jnp.zeros((B, H), jnp.float32)
    h_b = jnp.zeros((B, H), jnp.float32)
    outs_f, outs_b = [None] * S, [None] * S
    for t in range(S):
        mt = mask[:, t:t + 1]
        h_f = mt * jnp.tanh(xproj_f[:, t, :] + h_f @ params["whh_f"]) + (1 - mt) * h_f
        outs_f[t] = mt * h_f
        tb = S - 1 - t
        mtb = mask[:, tb:tb + 1]
        h_b = mtb * jnp.tanh(xproj_b[:, tb, :] + h_b @ params["whh_b"]) + (1 - mtb) * h_b
        outs_b[tb] = mtb * h_b
    rnn_out = jnp.concatenate([jnp.stack(outs_f, 1), jnp.stack(outs_b, 1)], axis=-1)
    y = jnp.einsum("bso,op->bsp", rnn_out, params["w_lin"]) + params["b_lin"]
    return y, jnp.stack([h_f, h_b], axis=0)


if __name__ == "__main__":
    B, S, D, H = 2, 8, 32, 32

    config = {
        "rnn_layer": {"name": "birnn", "bidirectional": True},
        "output_layer": {"dropout": 0},
        "other_stuff": {"output_representations": False},
    }

    key = jax.random.PRNGKey(0)
    ks = jax.random.split(key, 9)
    params = {
        "wih_f": 0.1 * jax.random.normal(ks[0], (D, H), jnp.float32),
        "whh_f": 0.1 * jax.random.normal(ks[1], (H, H), jnp.float32),
        "b_f":   0.1 * jax.random.normal(ks[2], (1, H), jnp.float32),
        "wih_b": 0.1 * jax.random.normal(ks[3], (D, H), jnp.float32),
        "whh_b": 0.1 * jax.random.normal(ks[4], (H, H), jnp.float32),
        "b_b":   0.1 * jax.random.normal(ks[5], (1, H), jnp.float32),
        "w_lin": 0.1 * jax.random.normal(ks[6], (2 * H, 2 * H), jnp.float32),
        "b_lin": 0.1 * jax.random.normal(ks[7], (1, 2 * H), jnp.float32),
    }

    embedded = jax.random.normal(ks[8], (B, S, D), jnp.float32)
    # Ragged lengths with max < S: padded steps are mask-driven no-ops in the kernel.
    lengths = jnp.array([6, 5], jnp.int32)
    mask = (jnp.arange(S)[None, :] < lengths[:, None]).astype(jnp.float32)  # (B, S)

    result = flexible_rnn_layer(embedded, mask, params, config)
    jax.block_until_ready(result)

    # correctness check vs pure-JAX reference (bf16 MXU operands in the recurrence)
    ref_out, ref_hid = _reference(embedded, mask, params)
    full_out = jnp.concatenate([result["forward_output"], result["backward_output"]], -1)
    assert jnp.allclose(full_out, ref_out, atol=1e-2, rtol=1e-2)
    assert jnp.allclose(result["hidden"], ref_hid, atol=1e-2, rtol=1e-2)
    assert result["forward_output"].shape == (B, S, H)
    assert result["backward_output"].shape == (B, S, H)
    assert result["hidden"].shape == (2, B, H)

    print("KERNEL_OK")
</pallas_src>

<mosaic_0001>
module attributes {stable_mosaic.version = 11 : i64} {
  func.func @_birnn_recurrence_kernel(%arg0: i32, %arg1: memref<8x2x64xf32, #tpu.memory_space<vmem>>, %arg2: memref<8x2x64xf32, #tpu.memory_space<vmem>>, %arg3: memref<64x64xbf16, #tpu.memory_space<vmem>>, %arg4: memref<8x2x64xf32, #tpu.memory_space<vmem>>, %arg5: memref<2x64xf32, #tpu.memory_space<vmem>>) attributes {dimension_semantics = [#tpu.dimension_semantics<parallel>], iteration_bounds = array<i64: 1>, scalar_prefetch = 0 : i64, scratch_operands = 0 : i64, tpu.core_type = #tpu.core_type<tc>, window_params = [{transform_indices = @transform_0, window_bounds = array<i64: 8, 2, 64>}, {transform_indices = @transform_1, window_bounds = array<i64: 8, 2, 64>}, {pipeline_mode = #tpu.pipeline_mode<synchronous>, transform_indices = @transform_2, window_bounds = array<i64: 64, 64>}, {transform_indices = @transform_3, window_bounds = array<i64: 8, 2, 64>}, {transform_indices = @transform_4, window_bounds = array<i64: 2, 64>}]} {
    %c0 = arith.constant 0 : index
    %c0_0 = arith.constant 0 : index
    %0 = vector.load %arg3[%c0, %c0_0] : memref<64x64xbf16, #tpu.memory_space<vmem>>, vector<64x64xbf16>
    %cst = arith.constant 0.000000e+00 : f32
    %1 = vector.broadcast %cst : f32 to vector<2x64xf32>
    %c0_i32 = arith.constant 0 : i32
    %2 = arith.index_cast %c0_i32 : i32 to index
    %c0_1 = arith.constant 0 : index
    %c0_2 = arith.constant 0 : index
    %3 = vector.load %arg1[%2, %c0_1, %c0_2] : memref<8x2x64xf32, #tpu.memory_space<vmem>>, vector<1x2x64xf32>
    %4 = vector.shape_cast %3 : vector<1x2x64xf32> to vector<2x64xf32>
    %5 = arith.index_cast %c0_i32 : i32 to index
    %c0_3 = arith.constant 0 : index
    %c0_4 = arith.constant 0 : index
    %6 = vector.load %arg2[%5, %c0_3, %c0_4] : memref<8x2x64xf32, #tpu.memory_space<vmem>>, vector<1x2x64xf32>
    %7 = vector.shape_cast %6 : vector<1x2x64xf32> to vector<2x64xf32>
    %8 = arith.truncf %1 : vector<2x64xf32> to vector<2x64xbf16>
    %cst_5 = arith.constant dense<0.000000e+00> : vector<2x64xf32>
    %9 = tpu.matmul %8, %0, %cst_5 {dimension_numbers = #tpu.dot_dimension_numbers<[1], [0], [0], [1], [0, 0, 1, 1], [], []>} : vector<2x64xbf16>, vector<64x64xbf16>, vector<2x64xf32> -> vector<2x64xf32>
    %10 = arith.addf %4, %9 : vector<2x64xf32>
    %11 = math.tanh %10 : vector<2x64xf32>
    %12 = arith.mulf %7, %11 : vector<2x64xf32>
    %13 = arith.index_cast %c0_i32 : i32 to index
    %c0_6 = arith.constant 0 : index
    %c0_7 = arith.constant 0 : index
    %14 = vector.load %arg4[%13, %c0_6, %c0_7] : memref<8x2x64xf32, #tpu.memory_space<vmem>>, vector<1x2x64xf32>
    %15 = vector.shape_cast %14 : vector<1x2x64xf32> to vector<2x64xf32>
    %16 = vector.shape_cast %12 : vector<2x64xf32> to vector<1x2x64xf32>
    tpu.vector_store %arg4[%13, %c0_6, %c0_7], %16 {strides = array<i32>} : memref<8x2x64xf32, #tpu.memory_space<vmem>>, vector<1x2x64xf32>,
    %17 = arith.subf %11, %1 : vector<2x64xf32>
    %18 = arith.mulf %7, %17 : vector<2x64xf32>
    %19 = arith.addf %1, %18 : vector<2x64xf32>
    %c1_i32 = arith.constant 1 : i32
    %20 = arith.index_cast %c1_i32 : i32 to index
    %c0_8 = arith.constant 0 : index
    %c0_9 = arith.constant 0 : index
    %21 = vector.load %arg1[%20, %c0_8, %c0_9] : memref<8x2x64xf32, #tpu.memory_space<vmem>>, vector<1x2x64xf32>
    %22 = vector.shape_cast %21 : vector<1x2x64xf32> to vector<2x64xf32>
    %23 = arith.index_cast %c1_i32 : i32 to index
    %c0_10 = arith.constant 0 : index
    %c0_11 = arith.constant 0 : index
    %24 = vector.load %arg2[%23, %c0_10, %c0_11] : memref<8x2x64xf32, #tpu.memory_space<vmem>>, vector<1x2x64xf32>
    %25 = vector.shape_cast %24 : vector<1x2x64xf32> to vector<2x64xf32>
    %26 = arith.truncf %19 : vector<2x64xf32> to vector<2x64xbf16>
    %cst_12 = arith.constant dense<0.000000e+00> : vector<2x64xf32>
    %27 = tpu.matmul %26, %0, %cst_12 {dimension_numbers = #tpu.dot_dimension_numbers<[1], [0], [0], [1], [0, 0, 1, 1], [], []>} : vector<2x64xbf16>, vector<64x64xbf16>, vector<2x64xf32> -> vector<2x64xf32>
    %28 = arith.addf %22, %27 : vector<2x64xf32>
    %29 = math.tanh %28 : vector<2x64xf32>
    %30 = arith.mulf %25, %29 : vector<2x64xf32>
    %31 = arith.index_cast %c1_i32 : i32 to index
    %c0_13 = arith.constant 0 : index
    %c0_14 = arith.constant 0 : index
    %32 = vector.load %arg4[%31, %c0_13, %c0_14] : memref<8x2x64xf32, #tpu.memory_space<vmem>>, vector<1x2x64xf32>
    %33 = vector.shape_cast %32 : vector<1x2x64xf32> to vector<2x64xf32>
    %34 = vector.shape_cast %30 : vector<2x64xf32> to vector<1x2x64xf32>
    tpu.vector_store %arg4[%31, %c0_13, %c0_14], %34 {strides = array<i32>} : memref<8x2x64xf32, #tpu.memory_space<vmem>>, vector<1x2x64xf32>,
    %35 = arith.subf %29, %19 : vector<2x64xf32>
    %36 = arith.mulf %25, %35 : vector<2x64xf32>
    %37 = arith.addf %19, %36 : vector<2x64xf32>
    %c2_i32 = arith.constant 2 : i32
    %38 = arith.index_cast %c2_i32 : i32 to index
    %c0_15 = arith.constant 0 : index
    %c0_16 = arith.constant 0 : index
    %39 = vector.load %arg1[%38, %c0_15, %c0_16] : memref<8x2x64xf32, #tpu.memory_space<vmem>>, vector<1x2x64xf32>
    %40 = vector.shape_cast %39 : vector<1x2x64xf32> to vector<2x64xf32>
    %41 = arith.index_cast %c2_i32 : i32 to index
    %c0_17 = arith.constant 0 : index
    %c0_18 = arith.constant 0 : index
    %42 = vector.load %arg2[%41, %c0_17, %c0_18] : memref<8x2x64xf32, #tpu.memory_space<vmem>>, vector<1x2x64xf32>
    %43 = vector.shape_cast %42 : vector<1x2x64xf32> to vector<2x64xf32>
    %44 = arith.truncf %37 : vector<2x64xf32> to vector<2x64xbf16>
    %cst_19 = arith.constant dense<0.000000e+00> : vector<2x64xf32>
    %45 = tpu.matmul %44, %0, %cst_19 {dimension_numbers = #tpu.dot_dimension_numbers<[1], [0], [0], [1], [0, 0, 1, 1], [], []>} : vector<2x64xbf16>, vector<64x64xbf16>, vector<2x64xf32> -> vector<2x64xf32>
    %46 = arith.addf %40, %45 : vector<2x64xf32>
    %47 = math.tanh %46 : vector<2x64xf32>
    %48 = arith.mulf %43, %47 : vector<2x64xf32>
    %49 = arith.index_cast %c2_i32 : i32 to index
    %c0_20 = arith.constant 0 : index
    %c0_21 = arith.constant 0 : index
    %50 = vector.load %arg4[%49, %c0_20, %c0_21] : memref<8x2x64xf32, #tpu.memory_space<vmem>>, vector<1x2x64xf32>
    %51 = vector.shape_cast %50 : vector<1x2x64xf32> to vector<2x64xf32>
    %52 = vector.shape_cast %48 : vector<2x64xf32> to vector<1x2x64xf32>
    tpu.vector_store %arg4[%49, %c0_20, %c0_21], %52 {strides = array<i32>} : memref<8x2x64xf32, #tpu.memory_space<vmem>>, vector<1x2x64xf32>,
    %53 = arith.subf %47, %37 : vector<2x64xf32>
    %54 = arith.mulf %43, %53 : vector<2x64xf32>
    %55 = arith.addf %37, %54 : vector<2x64xf32>
    %c3_i32 = arith.constant 3 : i32
    %56 = arith.index_cast %c3_i32 : i32 to index
    %c0_22 = arith.constant 0 : index
    %c0_23 = arith.constant 0 : index
    %57 = vector.load %arg1[%56, %c0_22, %c0_23] : memref<8x2x64xf32, #tpu.memory_space<vmem>>, vector<1x2x64xf32>
    %58 = vector.shape_cast %57 : vector<1x2x64xf32> to vector<2x64xf32>
    %59 = arith.index_cast %c3_i32 : i32 to index
    %c0_24 = arith.constant 0 : index
    %c0_25 = arith.constant 0 : index
    %60 = vector.load %arg2[%59, %c0_24, %c0_25] : memref<8x2x64xf32, #tpu.memory_space<vmem>>, vector<1x2x64xf32>
    %61 = vector.shape_cast %60 : vector<1x2x64xf32> to vector<2x64xf32>
    %62 = arith.truncf %55 : vector<2x64xf32> to vector<2x64xbf16>
    %cst_26 = arith.constant dense<0.000000e+00> : vector<2x64xf32>
    %63 = tpu.matmul %62, %0, %cst_26 {dimension_numbers = #tpu.dot_dimension_numbers<[1], [0], [0], [1], [0, 0, 1, 1], [], []>} : vector<2x64xbf16>, vector<64x64xbf16>, vector<2x64xf32> -> vector<2x64xf32>
    %64 = arith.addf %58, %63 : vector<2x64xf32>
    %65 = math.tanh %64 : vector<2x64xf32>
    %66 = arith.mulf %61, %65 : vector<2x64xf32>
    %67 = arith.index_cast %c3_i32 : i32 to index
    %c0_27 = arith.constant 0 : index
    %c0_28 = arith.constant 0 : index
    %68 = vector.load %arg4[%67, %c0_27, %c0_28] : memref<8x2x64xf32, #tpu.memory_space<vmem>>, vector<1x2x64xf32>
    %69 = vector.shape_cast %68 : vector<1x2x64xf32> to vector<2x64xf32>
    %70 = vector.shape_cast %66 : vector<2x64xf32> to vector<1x2x64xf32>
    tpu.vector_store %arg4[%67, %c0_27, %c0_28], %70 {strides = array<i32>} : memref<8x2x64xf32, #tpu.memory_space<vmem>>, vector<1x2x64xf32>,
    %71 = arith.subf %65, %55 : vector<2x64xf32>
    %72 = arith.mulf %61, %71 : vector<2x64xf32>
    %73 = arith.addf %55, %72 : vector<2x64xf32>
    %c4_i32 = arith.constant 4 : i32
    %74 = arith.index_cast %c4_i32 : i32 to index
    %c0_29 = arith.constant 0 : index
    %c0_30 = arith.constant 0 : index
    %75 = vector.load %arg1[%74, %c0_29, %c0_30] : memref<8x2x64xf32, #tpu.memory_space<vmem>>, vector<1x2x64xf32>
    %76 = vector.shape_cast %75 : vector<1x2x64xf32> to vector<2x64xf32>
    %77 = arith.index_cast %c4_i32 : i32 to index
    %c0_31 = arith.constant 0 : index
    %c0_32 = arith.constant 0 : index
    %78 = vector.load %arg2[%77, %c0_31, %c0_32] : memref<8x2x64xf32, #tpu.memory_space<vmem>>, vector<1x2x64xf32>
    %79 = vector.shape_cast %78 : vector<1x2x64xf32> to vector<2x64xf32>
    %80 = arith.truncf %73 : vector<2x64xf32> to vector<2x64xbf16>
    %cst_33 = arith.constant dense<0.000000e+00> : vector<2x64xf32>
    %81 = tpu.matmul %80, %0, %cst_33 {dimension_numbers = #tpu.dot_dimension_numbers<[1], [0], [0], [1], [0, 0, 1, 1], [], []>} : vector<2x64xbf16>, vector<64x64xbf16>, vector<2x64xf32> -> vector<2x64xf32>
    %82 = arith.addf %76, %81 : vector<2x64xf32>
    %83 = math.tanh %82 : vector<2x64xf32>
    %84 = arith.mulf %79, %83 : vector<2x64xf32>
    %85 = arith.index_cast %c4_i32 : i32 to index
    %c0_34 = arith.constant 0 : index
    %c0_35 = arith.constant 0 : index
    %86 = vector.load %arg4[%85, %c0_34, %c0_35] : memref<8x2x64xf32, #tpu.memory_space<vmem>>, vector<1x2x64xf32>
    %87 = vector.shape_cast %86 : vector<1x2x64xf32> to vector<2x64xf32>
    %88 = vector.shape_cast %84 : vector<2x64xf32> to vector<1x2x64xf32>
    tpu.vector_store %arg4[%85, %c0_34, %c0_35], %88 {strides = array<i32>} : memref<8x2x64xf32, #tpu.memory_space<vmem>>, vector<1x2x64xf32>,
    %89 = arith.subf %83, %73 : vector<2x64xf32>
    %90 = arith.mulf %79, %89 : vector<2x64xf32>
    %91 = arith.addf %73, %90 : vector<2x64xf32>
    %c5_i32 = arith.constant 5 : i32
    %92 = arith.index_cast %c5_i32 : i32 to index
    %c0_36 = arith.constant 0 : index
    %c0_37 = arith.constant 0 : index
    %93 = vector.load %arg1[%92, %c0_36, %c0_37] : memref<8x2x64xf32, #tpu.memory_space<vmem>>, vector<1x2x64xf32>
    %94 = vector.shape_cast %93 : vector<1x2x64xf32> to vector<2x64xf32>
    %95 = arith.index_cast %c5_i32 : i32 to index
    %c0_38 = arith.constant 0 : index
    %c0_39 = arith.constant 0 : index
    %96 = vector.load %arg2[%95, %c0_38, %c0_39] : memref<8x2x64xf32, #tpu.memory_space<vmem>>, vector<1x2x64xf32>
    %97 = vector.shape_cast %96 : vector<1x2x64xf32> to vector<2x64xf32>
    %98 = arith.truncf %91 : vector<2x64xf32> to vector<2x64xbf16>
    %cst_40 = arith.constant dense<0.000000e+00> : vector<2x64xf32>
    %99 = tpu.matmul %98, %0, %cst_40 {dimension_numbers = #tpu.dot_dimension_numbers<[1], [0], [0], [1], [0, 0, 1, 1], [], []>} : vector<2x64xbf16>, vector<64x64xbf16>, vector<2x64xf32> -> vector<2x64xf32>
    %100 = arith.addf %94, %99 : vector<2x64xf32>
    %101 = math.tanh %100 : vector<2x64xf32>
    %102 = arith.mulf %97, %101 : vector<2x64xf32>
    %103 = arith.index_cast %c5_i32 : i32 to index
    %c0_41 = arith.constant 0 : index
    %c0_42 = arith.constant 0 : index
    %104 = vector.load %arg4[%103, %c0_41, %c0_42] : memref<8x2x64xf32, #tpu.memory_space<vmem>>, vector<1x2x64xf32>
    %105 = vector.shape_cast %104 : vector<1x2x64xf32> to vector<2x64xf32>
    %106 = vector.shape_cast %102 : vector<2x64xf32> to vector<1x2x64xf32>
    tpu.vector_store %arg4[%103, %c0_41, %c0_42], %106 {strides = array<i32>} : memref<8x2x64xf32, #tpu.memory_space<vmem>>, vector<1x2x64xf32>,
    %107 = arith.subf %101, %91 : vector<2x64xf32>
    %108 = arith.mulf %97, %107 : vector<2x64xf32>
    %109 = arith.addf %91, %108 : vector<2x64xf32>
    %c6_i32 = arith.constant 6 : i32
    %110 = arith.index_cast %c6_i32 : i32 to index
    %c0_43 = arith.constant 0 : index
    %c0_44 = arith.constant 0 : index
    %111 = vector.load %arg1[%110, %c0_43, %c0_44] : memref<8x2x64xf32, #tpu.memory_space<vmem>>, vector<1x2x64xf32>
    %112 = vector.shape_cast %111 : vector<1x2x64xf32> to vector<2x64xf32>
    %113 = arith.index_cast %c6_i32 : i32 to index
    %c0_45 = arith.constant 0 : index
    %c0_46 = arith.constant 0 : index
    %114 = vector.load %arg2[%113, %c0_45, %c0_46] : memref<8x2x64xf32, #tpu.memory_space<vmem>>, vector<1x2x64xf32>
    %115 = vector.shape_cast %114 : vector<1x2x64xf32> to vector<2x64xf32>
    %116 = arith.truncf %109 : vector<2x64xf32> to vector<2x64xbf16>
    %cst_47 = arith.constant dense<0.000000e+00> : vector<2x64xf32>
    %117 = tpu.matmul %116, %0, %cst_47 {dimension_numbers = #tpu.dot_dimension_numbers<[1], [0], [0], [1], [0, 0, 1, 1], [], []>} : vector<2x64xbf16>, vector<64x64xbf16>, vector<2x64xf32> -> vector<2x64xf32>
    %118 = arith.addf %112, %117 : vector<2x64xf32>
    %119 = math.tanh %118 : vector<2x64xf32>
    %120 = arith.mulf %115, %119 : vector<2x64xf32>
    %121 = arith.index_cast %c6_i32 : i32 to index
    %c0_48 = arith.constant 0 : index
    %c0_49 = arith.constant 0 : index
    %122 = vector.load %arg4[%121, %c0_48, %c0_49] : memref<8x2x64xf32, #tpu.memory_space<vmem>>, vector<1x2x64xf32>
    %123 = vector.shape_cast %122 : vector<1x2x64xf32> to vector<2x64xf32>
    %124 = vector.shape_cast %120 : vector<2x64xf32> to vector<1x2x64xf32>
    tpu.vector_store %arg4[%121, %c0_48, %c0_49], %124 {strides = array<i32>} : memref<8x2x64xf32, #tpu.memory_space<vmem>>, vector<1x2x64xf32>,
    %125 = arith.subf %119, %109 : vector<2x64xf32>
    %126 = arith.mulf %115, %125 : vector<2x64xf32>
    %127 = arith.addf %109, %126 : vector<2x64xf32>
    %c7_i32 = arith.constant 7 : i32
    %128 = arith.index_cast %c7_i32 : i32 to index
    %c0_50 = arith.constant 0 : index
    %c0_51 = arith.constant 0 : index
    %129 = vector.load %arg1[%128, %c0_50, %c0_51] : memref<8x2x64xf32, #tpu.memory_space<vmem>>, vector<1x2x64xf32>
    %130 = vector.shape_cast %129 : vector<1x2x64xf32> to vector<2x64xf32>
    %131 = arith.index_cast %c7_i32 : i32 to index
    %c0_52 = arith.constant 0 : index
    %c0_53 = arith.constant 0 : index
    %132 = vector.load %arg2[%131, %c0_52, %c0_53] : memref<8x2x64xf32, #tpu.memory_space<vmem>>, vector<1x2x64xf32>
    %133 = vector.shape_cast %132 : vector<1x2x64xf32> to vector<2x64xf32>
    %134 = arith.truncf %127 : vector<2x64xf32> to vector<2x64xbf16>
    %cst_54 = arith.constant dense<0.000000e+00> : vector<2x64xf32>
    %135 = tpu.matmul %134, %0, %cst_54 {dimension_numbers = #tpu.dot_dimension_numbers<[1], [0], [0], [1], [0, 0, 1, 1], [], []>} : vector<2x64xbf16>, vector<64x64xbf16>, vector<2x64xf32> -> vector<2x64xf32>
    %136 = arith.addf %130, %135 : vector<2x64xf32>
    %137 = math.tanh %136 : vector<2x64xf32>
    %138 = arith.mulf %133, %137 : vector<2x64xf32>
    %139 = arith.index_cast %c7_i32 : i32 to index
    %c0_55 = arith.constant 0 : index
    %c0_56 = arith.constant 0 : index
    %140 = vector.load %arg4[%139, %c0_55, %c0_56] : memref<8x2x64xf32, #tpu.memory_space<vmem>>, vector<1x2x64xf32>
    %141 = vector.shape_cast %140 : vector<1x2x64xf32> to vector<2x64xf32>
    %142 = vector.shape_cast %138 : vector<2x64xf32> to vector<1x2x64xf32>
    tpu.vector_store %arg4[%139, %c0_55, %c0_56], %142 {strides = array<i32>} : memref<8x2x64xf32, #tpu.memory_space<vmem>>, vector<1x2x64xf32>,
    %143 = arith.subf %137, %127 : vector<2x64xf32>
    %144 = arith.mulf %133, %143 : vector<2x64xf32>
    %145 = arith.addf %127, %144 : vector<2x64xf32>
    %c8_i32 = arith.constant 8 : i32
    %c0_57 = arith.constant 0 : index
    %c0_58 = arith.constant 0 : index
    %146 = vector.load %arg5[%c0_57, %c0_58] : memref<2x64xf32, #tpu.memory_space<vmem>>, vector<2x64xf32>
    tpu.vector_store %arg5[%c0_57, %c0_58], %145 {strides = array<i32>} : memref<2x64xf32, #tpu.memory_space<vmem>>, vector<2x64xf32>,
    return
  }
  func.func @transform_0(%arg0: i32) -> (i32, i32, i32) {
    %c0_i32 = arith.constant 0 : i32
    %c0_i32_0 = arith.constant 0 : i32
    %c0_i32_1 = arith.constant 0 : i32
    return %c0_i32, %arg0, %c0_i32_0 : i32, i32, i32
  }
  func.func @transform_1(%arg0: i32) -> (i32, i32, i32) {
    %c0_i32 = arith.constant 0 : i32
    %c0_i32_0 = arith.constant 0 : i32
    %c0_i32_1 = arith.constant 0 : i32
    return %c0_i32, %arg0, %c0_i32_0 : i32, i32, i32
  }
  func.func @transform_2(%arg0: i32) -> (i32, i32) {
    %c0_i32 = arith.constant 0 : i32
    %c0_i32_0 = arith.constant 0 : i32
    %c0_i32_1 = arith.constant 0 : i32
    return %c0_i32, %c0_i32_0 : i32, i32
  }
  func.func @transform_3(%arg0: i32) -> (i32, i32, i32) {
    %c0_i32 = arith.constant 0 : i32
    %c0_i32_0 = arith.constant 0 : i32
    %c0_i32_1 = arith.constant 0 : i32
    return %c0_i32, %arg0, %c0_i32_0 : i32, i32, i32
  }
  func.func @transform_4(%arg0: i32) -> (i32, i32) {
    %c0_i32 = arith.constant 0 : i32
    %c0_i32_0 = arith.constant 0 : i32
    return %arg0, %c0_i32 : i32, i32
  }
}

</mosaic_0001>

<bundles_post_ra>
// kernel: tpu_custom_call.1
= control target key start
LH: loop header
LB: loop body
LE: loop exit
PB: predicated region body
PF: predicated region fallthrough
CT: control target
= control target key end

     0   :  { %10 = vsyncpa [#allocation3], 0  ;;  %s1083_s0 = inlined_call_operand.hbm [shape: f32[8,2,64], index: 0, kind: input, shape index: {}]   ;;  %s1084_s1 = inlined_call_operand.hbm [shape: f32[8,2,64], index: 1, kind: input, shape index: {}]   ;;  %s1085_s2 = inlined_call_operand.hbm [shape: bf16[64,64], index: 2, kind: input, shape index: {}]   ;;  %s1086_s3 = inlined_call_operand.hbm [shape: f32[8,2,64], index: 3, kind: output, shape index: {0}]   ;;  %s1087_s4 = inlined_call_operand.hbm [shape: f32[2,64], index: 4, kind: output, shape index: {1}]  }
   0x1   :  { %11 = vsyncpa [#allocation6], 0 }
   0x2   :  { %12 = vsyncpa [#allocation4], 0 }
   0x3   :  { %13 = vsyncpa [#allocation10], 0  ;;  %s866_s15 = smov [#allocation5]   ;;  %s867_s17 = smov [#allocation2]  }
   0x4   :  { %s31_s16 = sshll.u32 %s866_s15, 4  ;;  %s19_s18 = sshll.u32 %s867_s17, 4  ;;  %s32_s16 = int_to_ptr.vmem [resolvable:$true] %s31_s16  ;;  %s903_s18 = int_to_ptr.vmem [resolvable:$true] %s19_s18 }
   0x5   :  { %s748_s21 = scalar_lea.hbm %s1084_s1, 256 }
   0x6   :  { %p749_p0 = scmp.ne.s32.totalorder %s1084_s1, %s748_s21  ;;  %p752_p1 = scmp.lt.u32.totalorder %s748_s21, %s1084_s1 }
   0x8   :  { %p754_p2 = pnand %p752_p1, %p749_p0 }
   0xa   :  { %757 = shalt.err (!%p754_p2)
}
   0xb   :  { %s758_s26 = scalar_lea.vmem %s32_s16, 256  ;;  %p763_p4 = scmp.lt.s32.totalorder %s32_s16, %s32_s16 }
   0xc   :  { %p759_p3 = scmp.ne.s32.totalorder %s32_s16, %s758_s26  ;;  %p764_p5 = scmp.lt.s32.totalorder %s758_s26, %s758_s26 }
   0xe   :  { %p765_p6 = por %p764_p5, %p763_p4 }
  0x10   :  { %p766_p7 = pnand %p765_p6, %p759_p3 }
  0x12   :  { %769 = shalt.err (!%p766_p7)
}
  0x13   :  { %s868_s27 = smov 32   ;;  %s869_s28 = smov 2  }
  0x14   :  { %37 = dma.hbm_to_vmem [thread:$0]  %s1084_s1, 256, %s32_s16, [#allocation6], %s868_s27, %s868_s27, %s869_s28  }
  0x15   :  { %s770_s7 = scalar_lea.hbm %s1083_s0, 256 }
  0x16   :  { %p771_p8 = scmp.ne.s32.totalorder %s1083_s0, %s770_s7  ;;  %p774_p9 = scmp.lt.u32.totalorder %s770_s7, %s1083_s0 }
  0x18   :  { %p776_p10 = pnand %p774_p9, %p771_p8 }
  0x1a   :  { %779 = shalt.err (!%p776_p10)
}
  0x1b   :  { %s780_s12 = scalar_lea.vmem %s903_s18, 256  ;;  %p785_p12 = scmp.lt.s32.totalorder %s903_s18, %s903_s18 }
  0x1c   :  { %p781_p11 = scmp.ne.s32.totalorder %s903_s18, %s780_s12  ;;  %p786_p13 = scmp.lt.s32.totalorder %s780_s12, %s780_s12 }
  0x1e   :  { %p787_p0 = por %p786_p13, %p785_p12 }
  0x20   :  { %p788_p1 = pnand %p787_p0, %p781_p11 }
  0x22   :  { %791 = shalt.err (!%p788_p1)
}
  0x23   :  { %25 = dma.hbm_to_vmem [thread:$0]  %s1083_s0, 256, %s903_s18, [#allocation3], %s868_s27, %s868_s27, %s869_s28  }
  0x24   :  { %s870_s14 = smov [#allocation7]   ;;  %s792_s19 = scalar_lea.hbm %s1085_s2, 512 }
  0x25   :  { %s43_s15 = sshll.u32 %s870_s14, 4  ;;  %p793_p2 = scmp.ne.s32.totalorder %s1085_s2, %s792_s19  ;;  %s44_s15 = int_to_ptr.vmem [resolvable:$true] %s43_s15 }
  0x26   :  { %p796_p3 = scmp.lt.u32.totalorder %s792_s19, %s1085_s2 }
  0x28   :  { %p798_p4 = pnand %p796_p3, %p793_p2 }
  0x2a   :  { %801 = shalt.err (!%p798_p4)
}
  0x2b   :  { %s802_s24 = scalar_lea.vmem %s44_s15, 512  ;;  %p807_p6 = scmp.lt.s32.totalorder %s44_s15, %s44_s15 }
  0x2c   :  { %p803_p5 = scmp.ne.s32.totalorder %s44_s15, %s802_s24  ;;  %p808_p7 = scmp.lt.s32.totalorder %s802_s24, %s802_s24 }
  0x2e   :  { %p809_p8 = por %p808_p7, %p807_p6 }
  0x30   :  { %p810_p9 = pnand %p809_p8, %p803_p5 }
  0x32   :  { %813 = shalt.err (!%p810_p9)
}
  0x33   :  { %s871_s0 = smov 64   ;;  %s872_s18 = smov 4  }
  0x34   :  { %49 = dma.hbm_to_vmem [thread:$0]  %s1085_s2, 512, %s44_s15, [#allocation6], %s871_s0, %s871_s0, %s872_s18  }
  0x35   :  { %858 = dma.done.wait [#allocation3], 256  }
  0x36   :  { %859 = vsyncadd [#allocation3], 4294967040 }
  0x37   :  { %860 = dma.done.wait [#allocation6], 768  }
  0x38   :  { %861 = vsyncadd [#allocation6], 4294966528  ;;  %v873_v0 = vmov 0.0   ;;  %vm874_vm0 = vmmov 0   ;;  %v958_v1 = vld [vmem:[#allocation7] sm:$0xff]   ;;  %v961_v2 = vld [vmem:[#allocation7 + $0x8] sm:$0xff]  }
  0x39   :  { %620 = vmatprep.subr.bf16.mxu0 %v873_v0  ;;  %628 = vmatprep.mubr.msk.bf16.mxu0 %vm874_vm0, %v873_v0  ;;  %v967_v3 = vld [vmem:[#allocation7 + $0x10] sm:$0xff]   ;;  %v973_v4 = vld [vmem:[#allocation7 + $0x18] sm:$0xff]   ;;  %v875_v5 = vmov 0   ;;  %v68_v6 = vld [vmem:[#allocation2] sm:$0x3]  ;;  %vm141_vm1 = vcmask 517120  }
  0x3a   :  { %632 = vmatprep.subr.bf16.mxu1 %v873_v0  ;;  %640 = vmatprep.mubr.msk.bf16.mxu1 %vm874_vm0, %v873_v0  ;;  %v69_v12 = vld [vmem:[#allocation5] sm:$0x3]  ;;  %vm94_vm2 = vcmask 523264   ;;  %v145_v16 = vld [vmem:[#allocation2 + $0x2] sm:$0x3]  ;;  %s876_s2 = smov [#allocation8]  }
  0x3b   :  { %621 = vmatpush3.bf16.msra.mxu0 %v958_v1  ;;  %633 = vmatpush3.bf16.msra.mxu1 %v958_v1  ;;  %v147_v22 = vld [vmem:[#allocation5 + $0x2] sm:$0x3]  ;;  %v201_v29 = vld [vmem:[#allocation2 + $0x4] sm:$0x3]  ;;  %v203_v35 = vld [vmem:[#allocation5 + $0x4] sm:$0x3] }
  0x3c   :  { %622 = vmatprep.subr.bf16.mxu0 %v873_v0  ;;  %634 = vmatprep.subr.bf16.mxu1 %v873_v0  ;;  %v257_v42 = vld [vmem:[#allocation2 + $0x6] sm:$0x3]  ;;  %v259_v48 = vld [vmem:[#allocation5 + $0x6] sm:$0x3]  ;;  %v313_v55 = vld [vmem:[#allocation2 + $0x8] sm:$0x3] }
  0x3d   :  { %v315_v61 = vld [vmem:[#allocation5 + $0x8] sm:$0x3]  ;;  %s542_s29 = sshll.u32 %s876_s2, 4  ;;  %s877_s30 = smov [#allocation9]   ;;  %s543_s29 = int_to_ptr.vmem [resolvable:$true] %s542_s29 }
  0x3e   :  { %s555_s5 = sshll.u32 %s877_s30, 4  ;;  %s814_s6 = scalar_lea.vmem %s543_s29, 256  ;;  %s556_s5 = int_to_ptr.vmem [resolvable:$true] %s555_s5 }
  0x3f   :  { %623 = vmatpush3.bf16.msra.mxu0 %v961_v2  ;;  %635 = vmatpush3.bf16.msra.mxu1 %v961_v2  ;;  %p815_p10 = scmp.ne.s32.totalorder %s543_s29, %s814_s6  ;;  %p819_p11 = scmp.lt.s32.totalorder %s543_s29, %s543_s29 }
  0x40   :  { %624 = vmatprep.subr.bf16.mxu0 %v873_v0  ;;  %636 = vmatprep.subr.bf16.mxu1 %v873_v0  ;;  %p820_p12 = scmp.lt.s32.totalorder %s814_s6, %s814_s6 }
  0x42   :  { %p821_p13 = por %p820_p12, %p819_p11 }
  0x43   :  { %625 = vmatpush3.bf16.msra.mxu0 %v967_v3  ;;  %637 = vmatpush3.bf16.msra.mxu1 %v967_v3 }
  0x44   :  { %626 = vmatprep.subr.bf16.mxu0 %v873_v0  ;;  %638 = vmatprep.subr.bf16.mxu1 %v873_v0  ;;  %p822_p0 = pnand %p821_p13, %p815_p10 }
  0x47   :  { %627 = vmatpush3.bf16.msra.mxu0 %v973_v4  ;;  %639 = vmatpush3.bf16.msra.mxu1 %v973_v4 }
  0x48   :  { %644 = vmatprep.subr.bf16.mxu0 %v873_v0  ;;  %656 = vmatprep.subr.bf16.mxu1 %v873_v0 }
  0x4a   :  { %629 = vmatmul.mubr.bf16.vlgmr.msra.gmra.mrb[0].mxu0 %v875_v5 }
  0x4b   :  { %645 = vmatpush3.bf16.msra.mxu0 %v958_v1  ;;  %652 = vmatprep.mubr.msk.bf16.mxu0 %vm874_vm0, %v873_v0 }
  0x4c   :  { %646 = vmatprep.subr.bf16.mxu0 %v873_v0 }
  0x4f   :  { %647 = vmatpush3.bf16.msra.mxu0 %v961_v2 }
  0x50   :  { %648 = vmatprep.subr.bf16.mxu0 %v873_v0 }
  0x53   :  { %649 = vmatpush3.bf16.msra.mxu0 %v967_v3 }
  0x54   :  { %650 = vmatprep.subr.bf16.mxu0 %v873_v0 }
  0x57   :  { %651 = vmatpush3.bf16.msra.mxu0 %v973_v4 }
  0x58   :  { %668 = vmatprep.subr.bf16.mxu0 %v873_v0 }
 0x11d   :  { %v132_v7 = vpop.f32.mrb[0].mxu0 }
 0x11e   :  { %v138_v8 = vadd.f32 %v132_v7, %v68_v6  ;;  %v630_v9 = vpop.f32.mrb[1].mxu0 }
 0x11f   :  { %v135_v10 = vpop.f32.mrb[2].mxu0  ;;  %v369_v9 = vld [vmem:[#allocation2 + $0xa] sm:$0x3] }
 0x120   :  { %732 = vtanh.f32 %v138_v8  ;;  %v631_v11 = vpop.f32.mrb[3].mxu0 }
 0x12a   :  { %v733_v13 = vpop.eup %732 }
 0x12b   :  { %v140_v14 = vmul.f32 %v733_v13, %v69_v12 }
 0x12d   :  { %142 = vst.msk [vmem:[#allocation8] sm:$0x3] %vm141_vm1, %v140_v14  ;;  %v148_v15 = vpack.c.bf16 %v140_v14, %v140_v14 }
 0x12f   :  { %641 = vmatmul.mubr.msk.bf16.vlgmr.msra.gmra.mrb[0].mxu1 %vm94_vm2, %v148_v15 }
 0x130   :  { %657 = vmatpush3.bf16.msra.mxu1 %v958_v1  ;;  %664 = vmatprep.mubr.msk.bf16.mxu1 %vm874_vm0, %v873_v0 }
 0x131   :  { %658 = vmatprep.subr.bf16.mxu1 %v873_v0 }
 0x134   :  { %659 = vmatpush3.bf16.msra.mxu1 %v961_v2 }
 0x135   :  { %660 = vmatprep.subr.bf16.mxu1 %v873_v0 }
 0x138   :  { %661 = vmatpush3.bf16.msra.mxu1 %v967_v3 }
 0x139   :  { %662 = vmatprep.subr.bf16.mxu1 %v873_v0 }
 0x13c   :  { %663 = vmatpush3.bf16.msra.mxu1 %v973_v4 }
 0x13d   :  { %680 = vmatprep.subr.bf16.mxu1 %v873_v0 }
 0x202   :  { %v186_v17 = vpop.f32.mrb[0].mxu1 }
 0x203   :  { %v192_v18 = vadd.f32 %v186_v17, %v145_v16  ;;  %v642_v19 = vpop.f32.mrb[1].mxu1 }
 0x204   :  { %v189_v20 = vpop.f32.mrb[2].mxu1 }
 0x205   :  { %734 = vtanh.f32 %v192_v18  ;;  %v643_v21 = vpop.f32.mrb[3].mxu1 }
 0x20f   :  { %v735_v23 = vpop.eup %734 }
 0x210   :  { %v194_v24 = vmul.f32 %v735_v23, %v147_v22  ;;  %v197_v25 = vsub.f32 %v735_v23, %v140_v14  ;;  %v427_v23 = vld [vmem:[#allocation5 + $0xc] sm:$0x3] }
 0x212   :  { %196 = vst.msk [vmem:[#allocation8 + $0x2] sm:$0x3] %vm141_vm1, %v194_v24  ;;  %v198_v26 = vmul.f32 %v197_v25, %v147_v22 }
 0x214   :  { %v199_v27 = vadd.f32 %v198_v26, %v140_v14  ;;  %v371_v14 = vld [vmem:[#allocation5 + $0xa] sm:$0x3] }
 0x216   :  { %v204_v28 = vpack.c.bf16 %v199_v27, %v199_v27 }
 0x218   :  { %653 = vmatmul.mubr.msk.bf16.vlgmr.msra.gmra.mrb[4].mxu0 %vm94_vm2, %v204_v28 }
 0x219   :  { %669 = vmatpush3.bf16.msra.mxu0 %v958_v1  ;;  %676 = vmatprep.mubr.msk.bf16.mxu0 %vm874_vm0, %v873_v0 }
 0x21a   :  { %670 = vmatprep.subr.bf16.mxu0 %v873_v0 }
 0x21d   :  { %671 = vmatpush3.bf16.msra.mxu0 %v961_v2 }
 0x21e   :  { %672 = vmatprep.subr.bf16.mxu0 %v873_v0 }
 0x221   :  { %673 = vmatpush3.bf16.msra.mxu0 %v967_v3 }
 0x222   :  { %674 = vmatprep.subr.bf16.mxu0 %v873_v0 }
 0x225   :  { %675 = vmatpush3.bf16.msra.mxu0 %v973_v4 }
 0x226   :  { %692 = vmatprep.subr.bf16.mxu0 %v873_v0 }
 0x2eb   :  { %v242_v30 = vpop.f32.mrb[4].mxu0 }
 0x2ec   :  { %v248_v31 = vadd.f32 %v242_v30, %v201_v29  ;;  %v654_v32 = vpop.f32.mrb[5].mxu0  ;;  %v481_v30 = vld [vmem:[#allocation2 + $0xe] sm:$0x3] }
 0x2ed   :  { %v245_v33 = vpop.f32.mrb[6].mxu0 }
 0x2ee   :  { %736 = vtanh.f32 %v248_v31  ;;  %v655_v34 = vpop.f32.mrb[7].mxu0 }
 0x2f8   :  { %v737_v36 = vpop.eup %736 }
 0x2f9   :  { %v250_v37 = vmul.f32 %v737_v36, %v203_v35  ;;  %v253_v38 = vsub.f32 %v737_v36, %v199_v27  ;;  %v483_v36 = vld [vmem:[#allocation5 + $0xe] sm:$0x3] }
 0x2fb   :  { %252 = vst.msk [vmem:[#allocation8 + $0x4] sm:$0x3] %vm141_vm1, %v250_v37  ;;  %v254_v39 = vmul.f32 %v253_v38, %v203_v35 }
 0x2fd   :  { %v255_v40 = vadd.f32 %v254_v39, %v199_v27 }
 0x2ff   :  { %v260_v41 = vpack.c.bf16 %v255_v40, %v255_v40 }
 0x301   :  { %665 = vmatmul.mubr.msk.bf16.vlgmr.msra.gmra.mrb[4].mxu1 %vm94_vm2, %v260_v41 }
 0x302   :  { %681 = vmatpush3.bf16.msra.mxu1 %v958_v1  ;;  %688 = vmatprep.mubr.msk.bf16.mxu1 %vm874_vm0, %v873_v0 }
 0x303   :  { %682 = vmatprep.subr.bf16.mxu1 %v873_v0 }
 0x306   :  { %683 = vmatpush3.bf16.msra.mxu1 %v961_v2 }
 0x307   :  { %684 = vmatprep.subr.bf16.mxu1 %v873_v0 }
 0x30a   :  { %685 = vmatpush3.bf16.msra.mxu1 %v967_v3 }
 0x30b   :  { %686 = vmatprep.subr.bf16.mxu1 %v873_v0 }
 0x30e   :  { %687 = vmatpush3.bf16.msra.mxu1 %v973_v4 }
 0x30f   :  { %704 = vmatprep.subr.bf16.mxu1 %v873_v0 }
 0x3d4   :  { %v298_v43 = vpop.f32.mrb[4].mxu1 }
 0x3d5   :  { %v304_v44 = vadd.f32 %v298_v43, %v257_v42  ;;  %v666_v45 = vpop.f32.mrb[5].mxu1 }
 0x3d6   :  { %v301_v46 = vpop.f32.mrb[6].mxu1 }
 0x3d7   :  { %738 = vtanh.f32 %v304_v44  ;;  %v667_v47 = vpop.f32.mrb[7].mxu1 }
 0x3e1   :  { %v739_v49 = vpop.eup %738 }
 0x3e2   :  { %v306_v50 = vmul.f32 %v739_v49, %v259_v48  ;;  %v309_v51 = vsub.f32 %v739_v49, %v255_v40 }
 0x3e4   :  { %308 = vst.msk [vmem:[#allocation8 + $0x6] sm:$0x3] %vm141_vm1, %v306_v50  ;;  %v310_v52 = vmul.f32 %v309_v51, %v259_v48 }
 0x3e6   :  { %v311_v53 = vadd.f32 %v310_v52, %v255_v40 }
 0x3e8   :  { %v316_v54 = vpack.c.bf16 %v311_v53, %v311_v53 }
 0x3ea   :  { %677 = vmatmul.mubr.msk.bf16.vlgmr.msra.gmra.mrb[8].mxu0 %vm94_vm2, %v316_v54 }
 0x3eb   :  { %693 = vmatpush3.bf16.msra.mxu0 %v958_v1  ;;  %700 = vmatprep.mubr.msk.bf16.mxu0 %vm874_vm0, %v873_v0 }
 0x3ec   :  { %694 = vmatprep.subr.bf16.mxu0 %v873_v0 }
 0x3ef   :  { %695 = vmatpush3.bf16.msra.mxu0 %v961_v2 }
 0x3f0   :  { %696 = vmatprep.subr.bf16.mxu0 %v873_v0 }
 0x3f3   :  { %697 = vmatpush3.bf16.msra.mxu0 %v967_v3 }
 0x3f4   :  { %698 = vmatprep.subr.bf16.mxu0 %v873_v0 }
 0x3f7   :  { %699 = vmatpush3.bf16.msra.mxu0 %v973_v4 }
 0x4bd   :  { %v354_v56 = vpop.f32.mrb[8].mxu0 }
 0x4be   :  { %v360_v57 = vadd.f32 %v354_v56, %v313_v55  ;;  %v678_v58 = vpop.f32.mrb[9].mxu0 }
 0x4bf   :  { %v357_v59 = vpop.f32.mrb[10].mxu0 }
 0x4c0   :  { %740 = vtanh.f32 %v360_v57  ;;  %v679_v60 = vpop.f32.mrb[11].mxu0 }
 0x4ca   :  { %v741_v62 = vpop.eup %740 }
 0x4cb   :  { %v362_v63 = vmul.f32 %v741_v62, %v315_v61  ;;  %v365_v5 = vsub.f32 %v741_v62, %v311_v53 }
 0x4cd   :  { %364 = vst.msk [vmem:[#allocation8 + $0x8] sm:$0x3] %vm141_vm1, %v362_v63  ;;  %v366_v6 = vmul.f32 %v365_v5, %v315_v61 }
 0x4cf   :  { %v367_v7 = vadd.f32 %v366_v6, %v311_v53 }
 0x4d1   :  { %v372_v8 = vpack.c.bf16 %v367_v7, %v367_v7 }
 0x4d3   :  { %689 = vmatmul.mubr.msk.bf16.vlgmr.msra.gmra.mrb[8].mxu1 %vm94_vm2, %v372_v8 }
 0x4d4   :  { %705 = vmatpush3.bf16.msra.mxu1 %v958_v1  ;;  %712 = vmatprep.mubr.msk.bf16.mxu1 %vm874_vm0, %v873_v0 }
 0x4d5   :  { %706 = vmatprep.subr.bf16.mxu1 %v873_v0 }
 0x4d8   :  { %707 = vmatpush3.bf16.msra.mxu1 %v961_v2 }
 0x4d9   :  { %708 = vmatprep.subr.bf16.mxu1 %v873_v0 }
 0x4dc   :  { %709 = vmatpush3.bf16.msra.mxu1 %v967_v3 }
 0x4dd   :  { %710 = vmatprep.subr.bf16.mxu1 %v873_v0  ;;  %v425_v0 = vld [vmem:[#allocation2 + $0xc] sm:$0x3] }
 0x4e0   :  { %711 = vmatpush3.bf16.msra.mxu1 %v973_v4 }
 0x5a6   :  { %v410_v10 = vpop.f32.mrb[8].mxu1 }
 0x5a7   :  { %v416_v11 = vadd.f32 %v410_v10, %v369_v9  ;;  %v690_v12 = vpop.f32.mrb[9].mxu1 }
 0x5a8   :  { %v413_v1 = vpop.f32.mrb[10].mxu1 }
 0x5a9   :  { %742 = vtanh.f32 %v416_v11  ;;  %v691_v13 = vpop.f32.mrb[11].mxu1 }
 0x5b3   :  { %v743_v15 = vpop.eup %742 }
 0x5b4   :  { %v418_v16 = vmul.f32 %v743_v15, %v371_v14  ;;  %v421_v17 = vsub.f32 %v743_v15, %v367_v7 }
 0x5b6   :  { %420 = vst.msk [vmem:[#allocation8 + $0xa] sm:$0x3] %vm141_vm1, %v418_v16  ;;  %v422_v2 = vmul.f32 %v421_v17, %v371_v14 }
 0x5b8   :  { %v423_v18 = vadd.f32 %v422_v2, %v367_v7 }
 0x5ba   :  { %v428_v3 = vpack.c.bf16 %v423_v18, %v423_v18 }
 0x5bc   :  { %701 = vmatmul.mubr.msk.bf16.vlgmr.msra.gmra.mrb[12].mxu0 %vm94_vm2, %v428_v3 }
 0x68f   :  { %v466_v4 = vpop.f32.mrb[12].mxu0 }
 0x690   :  { %v472_v19 = vadd.f32 %v466_v4, %v425_v0  ;;  %v702_v20 = vpop.f32.mrb[13].mxu0 }
 0x691   :  { %v469_v21 = vpop.f32.mrb[14].mxu0 }
 0x692   :  { %744 = vtanh.f32 %v472_v19  ;;  %v703_v22 = vpop.f32.mrb[15].mxu0 }
 0x69c   :  { %v745_v24 = vpop.eup %744 }
 0x69d   :  { %v474_v25 = vmul.f32 %v745_v24, %v427_v23  ;;  %v477_v26 = vsub.f32 %v745_v24, %v423_v18 }
 0x69f   :  { %476 = vst.msk [vmem:[#allocation8 + $0xc] sm:$0x3] %vm141_vm1, %v474_v25  ;;  %v478_v27 = vmul.f32 %v477_v26, %v427_v23 }
 0x6a1   :  { %v479_v28 = vadd.f32 %v478_v27, %v423_v18 }
 0x6a3   :  { %v484_v29 = vpack.c.bf16 %v479_v28, %v479_v28 }
 0x6a5   :  { %713 = vmatmul.mubr.msk.bf16.vlgmr.msra.gmra.mrb[12].mxu1 %vm94_vm2, %v484_v29 }
 0x778   :  { %v522_v31 = vpop.f32.mrb[12].mxu1 }
 0x779   :  { %v528_v32 = vadd.f32 %v522_v31, %v481_v30  ;;  %v714_v33 = vpop.f32.mrb[13].mxu1 }
 0x77a   :  { %v525_v34 = vpop.f32.mrb[14].mxu1 }
 0x77b   :  { %746 = vtanh.f32 %v528_v32  ;;  %v715_v35 = vpop.f32.mrb[15].mxu1 }
 0x785   :  { %v747_v37 = vpop.eup %746 }
 0x786   :  { %v530_v38 = vmul.f32 %v747_v37, %v483_v36  ;;  %v533_v39 = vsub.f32 %v747_v37, %v479_v28 }
 0x788   :  { %532 = vst.msk [vmem:[#allocation8 + $0xe] sm:$0x3] %vm141_vm1, %v530_v38  ;;  %v534_v40 = vmul.f32 %v533_v39, %v483_v36 }
 0x789   :  { %825 = shalt.err (!%p822_p0)
}
 0x78a   :  { %s826_s9 = scalar_lea.hbm %s1086_s3, 256 }
 0x78b   :  { %p827_p1 = scmp.ne.s32.totalorder %s1086_s3, %s826_s9  ;;  %p830_p2 = scmp.lt.u32.totalorder %s826_s9, %s1086_s3 }
 0x78d   :  { %p832_p3 = pnand %p830_p2, %p827_p1 }
 0x78f   :  { %835 = shalt.err (!%p832_p3)
}
 0x790   :  { %548 = dma.vmem_to_hbm [thread:$0]  %s543_s29, 256, %s1086_s3, [#allocation4], %s868_s27, %s868_s27, %s869_s28   ;;  %v535_v41 = vadd.f32 %v534_v40, %v479_v28 }
 0x791   :  { %s836_s15 = scalar_lea.vmem %s556_s5, 32  ;;  %p841_p5 = scmp.lt.s32.totalorder %s556_s5, %s556_s5 }
 0x792   :  { %536 = vst.msk [vmem:[#allocation9] sm:$0x3] %vm141_vm1, %v535_v41  ;;  %p837_p4 = scmp.ne.s32.totalorder %s556_s5, %s836_s15  ;;  %p842_p6 = scmp.lt.s32.totalorder %s836_s15, %s836_s15 }
 0x794   :  { %p843_p7 = por %p842_p6, %p841_p5 }
 0x796   :  { %p844_p8 = pnand %p843_p7, %p837_p4 }
 0x798   :  { %847 = shalt.err (!%p844_p8)
}
 0x799   :  { %s848_s19 = scalar_lea.hbm %s1087_s4, 32 }
 0x79a   :  { %p849_p9 = scmp.ne.s32.totalorder %s1087_s4, %s848_s19  ;;  %p852_p10 = scmp.lt.u32.totalorder %s848_s19, %s1087_s4 }
 0x79c   :  { %p854_p11 = pnand %p852_p10, %p849_p9 }
 0x79e   :  { %857 = shalt.err (!%p854_p11)
}
 0x79f   :  { %558 = dma.vmem_to_hbm [thread:$0]  %s556_s5, 32, %s1087_s4, [#allocation10]  }
 0x7a0   :  { %862 = dma.done.wait [#allocation4], 256  }
 0x7a1   :  { %863 = vsyncadd [#allocation4], 4294967040 }
 0x7a2   :  { %864 = dma.done.wait [#allocation10], 32  }
 0x7a3   :  { %865 = vsyncadd [#allocation10], 4294967264 }
 0x7a4   :  { %565 = vsyncpa [#allocation3], 1 }
 0x7a5   :  { %566 = vsyncpa [#allocation6], 1 }
 0x7a6   :  { %567 = vsyncpa [#allocation4], 1 }
 0x7a7   :  { %568 = vsyncpa [#allocation10], 1 }

</bundles_post_ra>
